<compile_context>
chip_gen: v5e
topology: v5e:2x2
jax: 0.10.0
libtpu: 0.0.40
codegen_flags: <defaults>
</compile_context>

<pallas_src>
import functools

import jax
import jax.numpy as jnp
from jax.experimental import pallas as pl
from jax.experimental.pallas import tpu as pltpu


def _ergas_sums_kernel(gt_ref, pred_ref, ssq_ref, sgt_ref, *,
                       hw_total: int, hw_tile: int, nh_per_split: int,
                       needs_mask: bool):
    """One (row-block, split, spatial-chunk) grid step.

    gt_ref / pred_ref : (row_tile, hw_tile) VMEM tiles
    ssq_ref / sgt_ref : (1, row_tile, 1) resident output blocks (accumulators)
    """
    s = pl.program_id(1)
    h = pl.program_id(2)

    @pl.when(h == 0)
    def _init():
        ssq_ref[...] = jnp.zeros_like(ssq_ref)
        sgt_ref[...] = jnp.zeros_like(sgt_ref)

    gt = gt_ref[...].astype(jnp.float32)
    pred = pred_ref[...].astype(jnp.float32)

    def _accumulate(g, p):
        diff = g - p
        ssq_ref[...] += jnp.sum(diff * diff, axis=-1, keepdims=True)[None]
        sgt_ref[...] += jnp.sum(g, axis=-1, keepdims=True)[None]

    if needs_mask:
        # Number of valid lanes left in this logical spatial chunk. Negative /
        # small values only occur for the last (ragged) chunk or for the
        # clamped overflow chunks of the last split.
        rem = hw_total - (s * nh_per_split + h) * hw_tile

        @pl.when(rem >= hw_tile)
        def _full_chunk():
            _accumulate(gt, pred)

        @pl.when(rem < hw_tile)
        def _ragged_chunk():
            lane = jax.lax.broadcasted_iota(jnp.int32, gt.shape, 1)
            valid = lane < rem
            _accumulate(jnp.where(valid, gt, 0.0),
                        jnp.where(valid, pred, 0.0))
    else:
        _accumulate(gt, pred)


def _pick_hw_tile(rows_padded: int, hw: int, itemsize: int,
                  target_bytes: int) -> int:
    """Largest lane-aligned (multiple of 128) spatial tile ~target_bytes,
    accounting for the sublane-padded footprint of the row axis."""
    hw_aligned = pl.cdiv(hw, 128) * 128
    max_tile = max(128, (target_bytes // (rows_padded * itemsize)) // 128 * 128)
    return min(hw_aligned, max_tile)


def ergas(gt: jax.Array, pred: jax.Array, ratio: int = 16, *,
          target_tile_bytes: int = 8 * 1024 * 1024) -> jax.Array:
    """ERGAS metric. gt, pred: (B, C, H, W). Returns a scalar float32."""
    assert gt.shape == pred.shape and gt.ndim == 4
    B, C, H, W = gt.shape
    BC = B * C
    HW = H * W
    itemsize = jnp.dtype(gt.dtype).itemsize

    # Row tiling: rows are (batch, channel) pairs. Keep the full extent when
    # small (block dim == array dim satisfies the sublane rule), otherwise
    # tile in a multiple of 8.
    ROW_CAP = 256
    row_tile = BC if BC <= ROW_CAP else ROW_CAP
    n_rb = pl.cdiv(BC, row_tile)

    # Real (sublane-padded) VMEM footprint per lane column of the tile.
    sub_mult = max(8, 32 // itemsize)          # 8 for f32, 16 for bf16, ...
    rows_padded = pl.cdiv(row_tile, sub_mult) * sub_mult

    hw_tile = _pick_hw_tile(rows_padded, HW, itemsize, target_tile_bytes)
    nh = pl.cdiv(HW, hw_tile)

    # Split the spatial reduction into two parallel halves so a v7x chip's
    # two TensorCores both get work even when B*C fits in one row block.
    nsplit = 2 if nh >= 2 else 1
    nh_ps = pl.cdiv(nh, nsplit)
    needs_mask = (HW % hw_tile != 0) or (nsplit * nh_ps != nh)

    gt2 = gt.reshape(BC, HW)       # free views of contiguous data, no HBM copy
    pred2 = pred.reshape(BC, HW)

    if nsplit * nh_ps == nh:
        def in_map(rb, s, h):
            return (rb, s * nh_ps + h)
    else:
        def in_map(rb, s, h):
            # Clamp the overflow chunks of the last split onto a valid block;
            # the kernel masks them to zero contribution.
            return (rb, jnp.minimum(s * nh_ps + h, nh - 1))

    kernel = functools.partial(
        _ergas_sums_kernel, hw_total=HW, hw_tile=hw_tile,
        nh_per_split=nh_ps, needs_mask=needs_mask)

    out_sd = jax.ShapeDtypeStruct((nsplit, BC, 1), jnp.float32)
    out_spec = pl.BlockSpec((1, row_tile, 1), lambda rb, s, h: (s, rb, 0))

    ssq, sgt = pl.pallas_call(
        kernel,
        out_shape=(out_sd, out_sd),
        grid=(n_rb, nsplit, nh_ps),
        in_specs=[pl.BlockSpec((row_tile, hw_tile), in_map),
                  pl.BlockSpec((row_tile, hw_tile), in_map)],
        out_specs=(out_spec, out_spec),
        compiler_params=pltpu.CompilerParams(
            dimension_semantics=("parallel", "parallel", "arbitrary"),
            vmem_limit_bytes=48 * 1024 * 1024,
        ),
    )(gt2, pred2)

    # Finalize in plain JAX on tiny (nsplit, B*C) arrays.
    sumsq = jnp.sum(ssq[..., 0], axis=0).reshape(B, C)
    sumgt = jnp.sum(sgt[..., 0], axis=0).reshape(B, C)
    mse = sumsq / HW
    mu = sumgt / HW
    rel = mse / (mu * mu)          # unguarded division: matches the reference
    ergas_batch = 100.0 * float(ratio) * jnp.sqrt(jnp.mean(rel, axis=1))
    return jnp.mean(ergas_batch)


def _ergas_reference(gt, pred, ratio=16):
    """Pure-JAX reference mirroring the PyTorch module."""
    diff = gt - pred
    mse_per_channel = jnp.mean(diff * diff, axis=(-2, -1))
    mu_gt_sq_per_channel = jnp.mean(gt, axis=(-2, -1)) ** 2
    ergas_batch = 100.0 * ratio * jnp.sqrt(
        jnp.mean(mse_per_channel / mu_gt_sq_per_channel, axis=1))
    return jnp.mean(ergas_batch)


if __name__ == "__main__":
    key = jax.random.PRNGKey(0)
    k1, k2, k3, k4, k5, k6 = jax.random.split(key, 6)

    # Case 1: small, lane-aligned spatial size (HW = 256).
    gt = jax.random.uniform(k1, (2, 4, 16, 16), jnp.float32, 0.5, 1.5)
    pred = gt + 0.05 * jax.random.normal(k2, (2, 4, 16, 16), jnp.float32)
    out = jax.block_until_ready(ergas(gt, pred, ratio=16))
    ref = _ergas_reference(gt, pred, ratio=16)
    assert jnp.allclose(out, ref, rtol=1e-5, atol=1e-5), (out, ref)

    # Case 2: ragged spatial size (HW = 400), exercises in-kernel masking.
    gt2 = jax.random.uniform(k3, (2, 3, 20, 20), jnp.float32, 0.5, 1.5)
    pred2 = gt2 + 0.05 * jax.random.normal(k4, (2, 3, 20, 20), jnp.float32)
    out2 = jax.block_until_ready(ergas(gt2, pred2, ratio=16))
    ref2 = _ergas_reference(gt2, pred2, ratio=16)
    assert jnp.allclose(out2, ref2, rtol=1e-5, atol=1e-5), (out2, ref2)

    # Case 3: tiny tile budget forces multi-chunk streaming, the 2-way
    # parallel spatial split, and the clamped overflow-chunk path (nh=3).
    gt3 = jax.random.uniform(k5, (2, 3, 20, 15), jnp.float32, 0.5, 1.5)
    pred3 = gt3 + 0.05 * jax.random.normal(k6, (2, 3, 20, 15), jnp.float32)
    out3 = jax.block_until_ready(
        ergas(gt3, pred3, ratio=16, target_tile_bytes=4096))
    ref3 = _ergas_reference(gt3, pred3, ratio=16)
    assert jnp.allclose(out3, ref3, rtol=1e-5, atol=1e-5), (out3, ref3)

    print("KERNEL_OK")
</pallas_src>

<mosaic_0001>
module attributes {stable_mosaic.version = 11 : i64} {
  func.func @_ergas_sums_kernel(%arg0: i32, %arg1: i32, %arg2: i32, %arg3: memref<8x256xf32, #tpu.memory_space<vmem>>, %arg4: memref<8x256xf32, #tpu.memory_space<vmem>>, %arg5: memref<1x8x1xf32, #tpu.memory_space<vmem>>, %arg6: memref<1x8x1xf32, #tpu.memory_space<vmem>>) attributes {dimension_semantics = [#tpu.dimension_semantics<parallel>, #tpu.dimension_semantics<parallel>, #tpu.dimension_semantics<arbitrary>], iteration_bounds = array<i64: 1, 1, 1>, scalar_prefetch = 0 : i64, scratch_operands = 0 : i64, tpu.core_type = #tpu.core_type<tc>, window_params = [{transform_indices = @transform_0, window_bounds = array<i64: 8, 256>}, {transform_indices = @transform_1, window_bounds = array<i64: 8, 256>}, {transform_indices = @transform_2, window_bounds = array<i64: 1, 8, 1>}, {transform_indices = @transform_3, window_bounds = array<i64: 1, 8, 1>}]} {
    %c0_i32 = arith.constant 0 : i32
    %0 = arith.cmpi eq, %arg2, %c0_i32 : i32
    %1 = arith.extui %0 : i1 to i32
    %c0_i32_0 = arith.constant 0 : i32
    %2 = arith.cmpi ne, %1, %c0_i32_0 : i32
    scf.if %2 {
      %cst_17 = arith.constant 0.000000e+00 : f32
      %19 = vector.broadcast %cst_17 : f32 to vector<1x8x1xf32>
      %c0_18 = arith.constant 0 : index
      %c0_19 = arith.constant 0 : index
      %c0_20 = arith.constant 0 : index
      %20 = vector.load %arg5[%c0_18, %c0_19, %c0_20] : memref<1x8x1xf32, #tpu.memory_space<vmem>>, vector<1x8x1xf32>
      tpu.vector_store %arg5[%c0_18, %c0_19, %c0_20], %19 {strides = array<i32>} : memref<1x8x1xf32, #tpu.memory_space<vmem>>, vector<1x8x1xf32>,
      %cst_21 = arith.constant 0.000000e+00 : f32
      %21 = vector.broadcast %cst_21 : f32 to vector<1x8x1xf32>
      %c0_22 = arith.constant 0 : index
      %c0_23 = arith.constant 0 : index
      %c0_24 = arith.constant 0 : index
      %22 = vector.load %arg6[%c0_22, %c0_23, %c0_24] : memref<1x8x1xf32, #tpu.memory_space<vmem>>, vector<1x8x1xf32>
      tpu.vector_store %arg6[%c0_22, %c0_23, %c0_24], %21 {strides = array<i32>} : memref<1x8x1xf32, #tpu.memory_space<vmem>>, vector<1x8x1xf32>,
    } else {
    }
    %c0 = arith.constant 0 : index
    %c0_1 = arith.constant 0 : index
    %3 = vector.load %arg3[%c0, %c0_1] : memref<8x256xf32, #tpu.memory_space<vmem>>, vector<8x256xf32>
    %c0_2 = arith.constant 0 : index
    %c0_3 = arith.constant 0 : index
    %4 = vector.load %arg4[%c0_2, %c0_3] : memref<8x256xf32, #tpu.memory_space<vmem>>, vector<8x256xf32>
    %5 = arith.subf %3, %4 : vector<8x256xf32>
    %c0_4 = arith.constant 0 : index
    %c0_5 = arith.constant 0 : index
    %c0_6 = arith.constant 0 : index
    %6 = vector.load %arg5[%c0_4, %c0_5, %c0_6] : memref<1x8x1xf32, #tpu.memory_space<vmem>>, vector<1x8x1xf32>
    %7 = arith.mulf %5, %5 : vector<8x256xf32>
    %cst = arith.constant dense<0.000000e+00> : vector<8xf32>
    %8 = vector.multi_reduction <add>, %7, %cst [1] : vector<8x256xf32> to vector<8xf32>
    %9 = vector.shape_cast %8 : vector<8xf32> to vector<8x1xf32>
    %10 = vector.shape_cast %9 : vector<8x1xf32> to vector<1x8x1xf32>
    %11 = arith.addf %6, %10 : vector<1x8x1xf32>
    %c0_7 = arith.constant 0 : index
    %c0_8 = arith.constant 0 : index
    %c0_9 = arith.constant 0 : index
    %12 = vector.load %arg5[%c0_7, %c0_8, %c0_9] : memref<1x8x1xf32, #tpu.memory_space<vmem>>, vector<1x8x1xf32>
    tpu.vector_store %arg5[%c0_7, %c0_8, %c0_9], %11 {strides = array<i32>} : memref<1x8x1xf32, #tpu.memory_space<vmem>>, vector<1x8x1xf32>,
    %c0_10 = arith.constant 0 : index
    %c0_11 = arith.constant 0 : index
    %c0_12 = arith.constant 0 : index
    %13 = vector.load %arg6[%c0_10, %c0_11, %c0_12] : memref<1x8x1xf32, #tpu.memory_space<vmem>>, vector<1x8x1xf32>
    %cst_13 = arith.constant dense<0.000000e+00> : vector<8xf32>
    %14 = vector.multi_reduction <add>, %3, %cst_13 [1] : vector<8x256xf32> to vector<8xf32>
    %15 = vector.shape_cast %14 : vector<8xf32> to vector<8x1xf32>
    %16 = vector.shape_cast %15 : vector<8x1xf32> to vector<1x8x1xf32>
    %17 = arith.addf %13, %16 : vector<1x8x1xf32>
    %c0_14 = arith.constant 0 : index
    %c0_15 = arith.constant 0 : index
    %c0_16 = arith.constant 0 : index
    %18 = vector.load %arg6[%c0_14, %c0_15, %c0_16] : memref<1x8x1xf32, #tpu.memory_space<vmem>>, vector<1x8x1xf32>
    tpu.vector_store %arg6[%c0_14, %c0_15, %c0_16], %17 {strides = array<i32>} : memref<1x8x1xf32, #tpu.memory_space<vmem>>, vector<1x8x1xf32>,
    return
  }
  func.func @transform_0(%arg0: i32, %arg1: i32, %arg2: i32) -> (i32, i32) {
    %c1_i32 = arith.constant 1 : i32
    %0 = arith.muli %arg1, %c1_i32 : i32
    %1 = arith.addi %0, %arg2 : i32
    %c0_i32 = arith.constant 0 : i32
    return %arg0, %1 : i32, i32
  }
  func.func @transform_1(%arg0: i32, %arg1: i32, %arg2: i32) -> (i32, i32) {
    %c1_i32 = arith.constant 1 : i32
    %0 = arith.muli %arg1, %c1_i32 : i32
    %1 = arith.addi %0, %arg2 : i32
    %c0_i32 = arith.constant 0 : i32
    return %arg0, %1 : i32, i32
  }
  func.func @transform_2(%arg0: i32, %arg1: i32, %arg2: i32) -> (i32, i32, i32) {
    %c0_i32 = arith.constant 0 : i32
    %c0_i32_0 = arith.constant 0 : i32
    return %arg1, %arg0, %c0_i32 : i32, i32, i32
  }
  func.func @transform_3(%arg0: i32, %arg1: i32, %arg2: i32) -> (i32, i32, i32) {
    %c0_i32 = arith.constant 0 : i32
    %c0_i32_0 = arith.constant 0 : i32
    return %arg1, %arg0, %c0_i32 : i32, i32, i32
  }
}

</mosaic_0001>

<bundles_post_ra>
// kernel: tpu_custom_call.1
= control target key start
LH: loop header
LB: loop body
LE: loop exit
PB: predicated region body
PF: predicated region fallthrough
CT: control target
= control target key end

     0   :  { %9 = vsyncpa [#allocation3], 0  ;;  %s197_s0 = inlined_call_operand.hbm [shape: f32[8,256], index: 0, kind: input, shape index: {}]   ;;  %s198_s1 = inlined_call_operand.hbm [shape: f32[8,256], index: 1, kind: input, shape index: {}]   ;;  %s199_s2 = inlined_call_operand.vmem [shape: f32[1,8,1], index: 2, kind: output, shape index: {0}]   ;;  %s200_s3 = inlined_call_operand.vmem [shape: f32[1,8,1], index: 3, kind: output, shape index: {1}]  }
   0x1   :  { %s20_s14 = sshll.u32 %s197_s0, 4  ;;  %s21_s14 = int_to_ptr.hbm [resolvable:$true] %s20_s14 }
   0x2   :  { %10 = vsyncpa [#allocation5], 0  ;;  %s146_s15 = smov [#allocation2]   ;;  %s35_s19 = sshll.u32 %s198_s1, 4  ;;  %s36_s19 = int_to_ptr.hbm [resolvable:$true] %s35_s19 }
   0x3   :  { %s22_s16 = sshll.u32 %s146_s15, 4  ;;  %s147_s20 = smov [#allocation4]   ;;  %s23_s16 = int_to_ptr.vmem [resolvable:$true] %s22_s16 }
   0x4   :  { %25 = dma.hbm_to_vmem [thread:$0]  %s21_s14, 256, %s23_s16, [#allocation3]  }
   0x5   :  { %s37_s21 = sshll.u32 %s147_s20, 4  ;;  %s38_s21 = int_to_ptr.vmem [resolvable:$true] %s37_s21 }
   0x6   :  { %40 = dma.hbm_to_vmem [thread:$0]  %s36_s19, 256, %s38_s21, [#allocation5]  }
   0x7   :  { %142 = dma.done.wait [#allocation3], 256  }
   0x8   :  { %143 = vsyncadd [#allocation3], 4294967040 }
   0x9   :  { %144 = dma.done.wait [#allocation5], 256  }
   0xa   :  { %145 = vsyncadd [#allocation5], 4294967040  ;;  %vm57_vm0 = vcmask 7168   ;;  %v148_v0 = vmov 0.0   ;;  %v60_v1 = vld [vmem:[#allocation2] sm:$0xff]  ;;  %v61_v2 = vld [vmem:[#allocation2 + $0x8] sm:$0xff] }
   0xb   :  { %58 = vst.msk [vmem:[%s199_s2] sm:$0xff] %vm57_vm0, %v148_v0  ;;  %v62_v3 = vld [vmem:[#allocation4] sm:$0xff]  ;;  %v63_v4 = vld [vmem:[#allocation4 + $0x8] sm:$0xff]  ;;  %v76_v10 = vadd.f32 %v61_v2, %v60_v1 }
   0xc   :  { %59 = vst.msk [vmem:[%s200_s3] sm:$0xff] %vm57_vm0, %v148_v0  ;;  %v64_v5 = vsub.f32 %v60_v1, %v62_v3  ;;  %v65_v6 = vsub.f32 %v61_v2, %v63_v4 }
   0xe   :  { %v67_v7 = vmul.f32 %v64_v5, %v64_v5  ;;  %v68_v8 = vmul.f32 %v65_v6, %v65_v6 }
  0x10   :  { %v69_v9 = vadd.f32 %v68_v8, %v67_v7 }
  0x12   :  { %70 = vadd.xlane.f32.xlu0 %v69_v9  ;;  %v66_v11 = vld [vmem:[%s199_s2] sm:$0xff] }
  0x13   :  { %v75_v14 = vld [vmem:[%s200_s3] sm:$0xff] }
  0x1a   :  { %77 = vadd.xlane.f32.xlu0 %v76_v10 }
  0x85   :  { %v71_v12 = vpop.xlane.xlu0 %70 }
  0x86   :  { %v72_v13 = vadd.f32 %v71_v12, %v66_v11 }
  0x88   :  { %74 = vst.msk [vmem:[%s199_s2] sm:$0xff] %vm57_vm0, %v72_v13 }
  0x8d   :  { %v78_v15 = vpop.xlane.xlu0 %77 }
  0x8e   :  { %v79_v16 = vadd.f32 %v78_v15, %v75_v14 }
  0x90   :  { %80 = vst.msk [vmem:[%s200_s3] sm:$0xff] %vm57_vm0, %v79_v16 }
  0x91   :  { %89 = vsyncpa [#allocation3], 1 }
  0x92   :  { %90 = vsyncpa [#allocation5], 1 }

</bundles_post_ra>
